<compile_context>
chip_gen: v5e
topology: v5e:2x2
jax: 0.10.0
libtpu: 0.0.40
codegen_flags: <defaults>
</compile_context>

<pallas_src>
import jax
import jax.numpy as jnp
from jax import lax
from jax.experimental import pallas as pl
from jax.experimental.pallas import tpu as pltpu


# --------- Pass 1: per-output-channel statistics of z = W @ x ---------------
def _stats_kernel(w_ref, x_ref, sumz_ref, sumzz_ref):
    # w_ref:     (Cout, Cin)    conv weight, VMEM-resident (constant index_map)
    # x_ref:     (nb, Cin, thw) one (batch-block, spatial-tile) block
    # sumz_ref:  (Cout, 1)      partial accumulator for this batch block
    # sumzz_ref: (Cout, 1)      partial accumulator of sum(z*z)
    @pl.when(pl.program_id(1) == 0)
    def _():
        sumz_ref[...] = jnp.zeros_like(sumz_ref)
        sumzz_ref[...] = jnp.zeros_like(sumzz_ref)

    w = w_ref[...]
    for i in range(x_ref.shape[0]):            # nb is a small static constant
        x = x_ref[i].astype(jnp.float32)       # (Cin, thw)
        z = jnp.dot(w, x, preferred_element_type=jnp.float32)   # (Cout, thw)
        sumz_ref[...] += jnp.sum(z, axis=1, keepdims=True)
        sumzz_ref[...] += jnp.sum(z * z, axis=1, keepdims=True)


# --------- Pass 2: recompute 1x1 conv, apply folded BN affine + ELU ----------
def _apply_kernel(w_ref, b_ref, x_ref, o_ref):
    # w_ref: (Cout, Cin)   BN scale folded into the conv weight
    # b_ref: (Cout, 1)     BN shift folded into the bias
    # x_ref: (nb, Cin, thw)
    # o_ref: (nb, Cout, thw)  lane-dense output block
    w = w_ref[...]
    b = b_ref[...]
    for i in range(x_ref.shape[0]):            # nb is a small static constant
        x = x_ref[i].astype(jnp.float32)
        z = jnp.dot(w, x, preferred_element_type=jnp.float32) + b
        # ELU (alpha = 1).  exp() runs on the EUP slot; |exp(z)-1 - expm1(z)|
        # ~ 1e-7 absolute in f32, well inside tolerance.
        # TODO(synk): switch to jnp.expm1 once its Mosaic lowering is confirmed.
        o_ref[i] = jnp.where(z > 0.0, z, jnp.exp(z) - 1.0).astype(o_ref.dtype)


def _choose_tiling(n, hw, cin, cout, in_itemsize, out_itemsize,
                   budget_bytes=20 << 20, max_nb=8):
    """Pick (nb, thw): how many images and how many spatial positions per
    grid step, from a VMEM working-set budget (double-buffered in/out blocks
    plus in-kernel f32 temps)."""
    per_pos = 2 * cin * in_itemsize + 2 * cout * out_itemsize + 4 * (cin + cout)
    max_pos = max(128, budget_bytes // per_pos)

    if hw <= max_pos:
        thw = hw
        nb = min(max_nb, n, max(1, max_pos // hw))
        if n >= 2:                      # keep >= 2 batch blocks (megacore / pipeline)
            nb = min(nb, max(1, n // 2))
        while n % nb:
            nb -= 1
        return nb, thw

    # hw is large: one image per step, largest 128-multiple tile dividing hw.
    t = (max_pos // 128) * 128
    while t >= 128:
        if hw % t == 0:
            return 1, t
        t -= 128
    # TODO(synk): ragged H*W with no 128-multiple divisor under the VMEM budget
    # falls back to one full block; add masked partial tiles if such shapes appear.
    return 1, hw


def logic_forward(x_nchw, conv_w, conv_b, bn_gamma, bn_beta, *, eps=1e-5):
    """x_nchw: (N, Cin, H, W); conv_w: (Cout, Cin, 1, 1) (PyTorch layouts)."""
    N, Cin, H, W = x_nchw.shape
    Cout = conv_w.shape[0]
    HW = H * W
    M = N * HW

    # NCHW -> (N, Cin, H*W): pure reshape, native dtype (no HBM-doubling upcast).
    x3d = x_nchw.reshape(N, Cin, HW)
    out_dtype = x_nchw.dtype

    nb, thw = _choose_tiling(N, HW, Cin, Cout,
                             jnp.dtype(x3d.dtype).itemsize,
                             jnp.dtype(out_dtype).itemsize)
    nbb = N // nb
    nt = HW // thw
    grid = (nbb, nt)

    w2 = conv_w.reshape(Cout, Cin).astype(jnp.float32)
    b2 = conv_b.reshape(Cout, 1).astype(jnp.float32)
    g2 = bn_gamma.reshape(Cout, 1).astype(jnp.float32)
    be2 = bn_beta.reshape(Cout, 1).astype(jnp.float32)

    x_bytes = x3d.size * jnp.dtype(x3d.dtype).itemsize
    out_bytes = N * Cout * HW * jnp.dtype(out_dtype).itemsize

    # ---- Pass 1: accumulate sum(z) / sum(z*z) per output channel -----------
    sum_z, sum_zz = pl.pallas_call(
        _stats_kernel,
        out_shape=(jax.ShapeDtypeStruct((nbb, Cout, 1), jnp.float32),
                   jax.ShapeDtypeStruct((nbb, Cout, 1), jnp.float32)),
        grid=grid,
        in_specs=[pl.BlockSpec((Cout, Cin), lambda n, t: (0, 0)),        # VMEM-resident
                  pl.BlockSpec((nb, Cin, thw), lambda n, t: (n, 0, t))],
        out_specs=(pl.BlockSpec((None, Cout, 1), lambda n, t: (n, 0, 0)),
                   pl.BlockSpec((None, Cout, 1), lambda n, t: (n, 0, 0))),
        compiler_params=pltpu.CompilerParams(
            dimension_semantics=("parallel", "arbitrary"),
            vmem_limit_bytes=32 << 20),
        cost_estimate=pl.CostEstimate(
            flops=2 * Cout * Cin * M + 4 * Cout * M,
            transcendentals=0,
            bytes_accessed=x_bytes + (Cout * Cin + 2 * nbb * Cout) * 4),
    )(w2, x3d)

    # ---- Tiny glue math: BN batch stats -> folded conv weight/bias ---------
    sum_z = jnp.sum(sum_z, axis=0)      # (Cout, 1)
    sum_zz = jnp.sum(sum_zz, axis=0)    # (Cout, 1)

    mean_wx = sum_z / M
    # TODO(synk): one-pass E[z^2]-E[z]^2 can lose accuracy in f32 when |mean| >> std;
    # switch to a shifted/two-pass accumulation if that regime matters.
    var_y = jnp.maximum(sum_zz / M - mean_wx * mean_wx, 0.0)   # bias b does not affect var
    mean_y = mean_wx + b2

    scale = g2 * lax.rsqrt(var_y + eps)          # gamma / sqrt(var + eps)
    w_eff = scale * w2                           # folded conv weight
    b_eff = scale * (b2 - mean_y) + be2          # folded bias
    # TODO(synk): running_mean/running_var (momentum, unbiased var) updates are
    # not produced; this mirrors the train-mode forward output only.

    # ---- Pass 2: recompute conv per tile, apply folded affine + ELU --------
    out3d = pl.pallas_call(
        _apply_kernel,
        out_shape=jax.ShapeDtypeStruct((N, Cout, HW), out_dtype),
        grid=grid,
        in_specs=[
            pl.BlockSpec((Cout, Cin), lambda n, t: (0, 0)),    # VMEM-resident
            pl.BlockSpec((Cout, 1), lambda n, t: (0, 0)),      # VMEM-resident
            pl.BlockSpec((nb, Cin, thw), lambda n, t: (n, 0, t)),
        ],
        out_specs=pl.BlockSpec((nb, Cout, thw), lambda n, t: (n, 0, t)),
        compiler_params=pltpu.CompilerParams(
            dimension_semantics=("parallel", "parallel"),
            vmem_limit_bytes=32 << 20),
        cost_estimate=pl.CostEstimate(
            flops=2 * Cout * Cin * M + 4 * Cout * M,
            transcendentals=Cout * M,
            bytes_accessed=x_bytes + out_bytes + (Cout * Cin + Cout) * 4),
    )(w_eff, b_eff, x3d)

    # (N, Cout, H*W) -> NCHW: pure reshape.
    return out3d.reshape(N, Cout, H, W)


def _reference(x_nchw, conv_w, conv_b, bn_gamma, bn_beta, eps=1e-5):
    # Pure-JAX reference of the same semantics (train-mode BN + ELU).
    N, Cin, H, W = x_nchw.shape
    Cout = conv_w.shape[0]
    x2d = jnp.transpose(x_nchw, (0, 2, 3, 1)).reshape(-1, Cin).astype(jnp.float32)
    y = x2d @ conv_w.reshape(Cout, Cin).T + conv_b
    mean = jnp.mean(y, axis=0, keepdims=True)
    var = jnp.mean((y - mean) ** 2, axis=0, keepdims=True)
    z = bn_gamma * (y - mean) / jnp.sqrt(var + eps) + bn_beta
    out = jnp.where(z > 0, z, jnp.expm1(z))
    return out.reshape(N, H, W, Cout).transpose(0, 3, 1, 2)


if __name__ == "__main__":
    key = jax.random.PRNGKey(0)
    k_x, k_w, k_b, k_g, k_be = jax.random.split(key, 5)

    N, Cin, H, W = 2, 4, 16, 16      # inplane = 4
    num_classes = 8                  # Cout

    x = jax.random.normal(k_x, (N, Cin, H, W), dtype=jnp.float32)
    conv_w = jax.random.normal(k_w, (num_classes, Cin, 1, 1), dtype=jnp.float32) * 0.2
    conv_b = jax.random.normal(k_b, (num_classes,), dtype=jnp.float32) * 0.1
    bn_gamma = 1.0 + 0.1 * jax.random.normal(k_g, (num_classes,), dtype=jnp.float32)
    bn_beta = 0.1 * jax.random.normal(k_be, (num_classes,), dtype=jnp.float32)

    out = logic_forward(x, conv_w, conv_b, bn_gamma, bn_beta)
    out = jax.block_until_ready(out)

    ref = _reference(x, conv_w, conv_b, bn_gamma, bn_beta)
    assert out.shape == (N, num_classes, H, W)
    assert jnp.allclose(out, ref, atol=1e-4, rtol=1e-4), "mismatch vs reference"

    print("KERNEL_OK")
</pallas_src>

<mosaic_0001>
module attributes {stable_mosaic.version = 11 : i64} {
  func.func @_stats_kernel(%arg0: i32, %arg1: i32, %arg2: memref<8x4xf32, #tpu.memory_space<vmem>>, %arg3: memref<1x4x256xf32, #tpu.memory_space<vmem>>, %arg4: memref<1x8x1xf32, #tpu.memory_space<vmem>>, %arg5: memref<1x8x1xf32, #tpu.memory_space<vmem>>) attributes {dimension_semantics = [#tpu.dimension_semantics<parallel>, #tpu.dimension_semantics<arbitrary>], iteration_bounds = array<i64: 2, 1>, scalar_prefetch = 0 : i64, scratch_operands = 0 : i64, tpu.core_type = #tpu.core_type<tc>, window_params = [{pipeline_mode = #tpu.pipeline_mode<synchronous>, transform_indices = @transform_0, window_bounds = array<i64: 8, 4>}, {transform_indices = @transform_1, window_bounds = array<i64: 1, 4, 256>}, {transform_indices = @transform_2, window_bounds = array<i64: 1, 8, 1>}, {transform_indices = @transform_3, window_bounds = array<i64: 1, 8, 1>}]} {
    %c0_i32 = arith.constant 0 : i32
    %0 = arith.cmpi eq, %arg1, %c0_i32 : i32
    %1 = arith.extui %0 : i1 to i32
    %c0_i32_0 = arith.constant 0 : i32
    %2 = arith.cmpi ne, %1, %c0_i32_0 : i32
    scf.if %2 {
      %cst_19 = arith.constant 0.000000e+00 : f32
      %24 = vector.broadcast %cst_19 : f32 to vector<8x1xf32>
      %c0_20 = arith.constant 0 : index
      %c0_21 = arith.constant 0 : index
      %c0_22 = arith.constant 0 : index
      %25 = vector.load %arg4[%c0_20, %c0_21, %c0_22] : memref<1x8x1xf32, #tpu.memory_space<vmem>>, vector<1x8x1xf32>
      %26 = vector.shape_cast %25 : vector<1x8x1xf32> to vector<8x1xf32>
      %27 = vector.shape_cast %24 : vector<8x1xf32> to vector<1x8x1xf32>
      tpu.vector_store %arg4[%c0_20, %c0_21, %c0_22], %27 {strides = array<i32>} : memref<1x8x1xf32, #tpu.memory_space<vmem>>, vector<1x8x1xf32>,
      %cst_23 = arith.constant 0.000000e+00 : f32
      %28 = vector.broadcast %cst_23 : f32 to vector<8x1xf32>
      %c0_24 = arith.constant 0 : index
      %c0_25 = arith.constant 0 : index
      %c0_26 = arith.constant 0 : index
      %29 = vector.load %arg5[%c0_24, %c0_25, %c0_26] : memref<1x8x1xf32, #tpu.memory_space<vmem>>, vector<1x8x1xf32>
      %30 = vector.shape_cast %29 : vector<1x8x1xf32> to vector<8x1xf32>
      %31 = vector.shape_cast %28 : vector<8x1xf32> to vector<1x8x1xf32>
      tpu.vector_store %arg5[%c0_24, %c0_25, %c0_26], %31 {strides = array<i32>} : memref<1x8x1xf32, #tpu.memory_space<vmem>>, vector<1x8x1xf32>,
    } else {
    }
    %c0 = arith.constant 0 : index
    %c0_1 = arith.constant 0 : index
    %3 = vector.load %arg2[%c0, %c0_1] : memref<8x4xf32, #tpu.memory_space<vmem>>, vector<8x4xf32>
    %c0_2 = arith.constant 0 : index
    %c0_3 = arith.constant 0 : index
    %c0_4 = arith.constant 0 : index
    %4 = vector.load %arg3[%c0_2, %c0_3, %c0_4] : memref<1x4x256xf32, #tpu.memory_space<vmem>>, vector<1x4x256xf32>
    %5 = vector.shape_cast %4 : vector<1x4x256xf32> to vector<4x256xf32>
    %cst = arith.constant dense<0.000000e+00> : vector<8x256xf32>
    %6 = tpu.matmul %3, %5, %cst {dimension_numbers = #tpu.dot_dimension_numbers<[1], [0], [0], [1], [0, 0, 1, 1], [], []>} : vector<8x4xf32>, vector<4x256xf32>, vector<8x256xf32> -> vector<8x256xf32>
    %c0_5 = arith.constant 0 : index
    %c0_6 = arith.constant 0 : index
    %c0_7 = arith.constant 0 : index
    %7 = vector.load %arg4[%c0_5, %c0_6, %c0_7] : memref<1x8x1xf32, #tpu.memory_space<vmem>>, vector<1x8x1xf32>
    %8 = vector.shape_cast %7 : vector<1x8x1xf32> to vector<8x1xf32>
    %cst_8 = arith.constant dense<0.000000e+00> : vector<8xf32>
    %9 = vector.multi_reduction <add>, %6, %cst_8 [1] : vector<8x256xf32> to vector<8xf32>
    %10 = vector.shape_cast %9 : vector<8xf32> to vector<8x1xf32>
    %11 = arith.addf %8, %10 : vector<8x1xf32>
    %c0_9 = arith.constant 0 : index
    %c0_10 = arith.constant 0 : index
    %c0_11 = arith.constant 0 : index
    %12 = vector.load %arg4[%c0_9, %c0_10, %c0_11] : memref<1x8x1xf32, #tpu.memory_space<vmem>>, vector<1x8x1xf32>
    %13 = vector.shape_cast %12 : vector<1x8x1xf32> to vector<8x1xf32>
    %14 = vector.shape_cast %11 : vector<8x1xf32> to vector<1x8x1xf32>
    tpu.vector_store %arg4[%c0_9, %c0_10, %c0_11], %14 {strides = array<i32>} : memref<1x8x1xf32, #tpu.memory_space<vmem>>, vector<1x8x1xf32>,
    %c0_12 = arith.constant 0 : index
    %c0_13 = arith.constant 0 : index
    %c0_14 = arith.constant 0 : index
    %15 = vector.load %arg5[%c0_12, %c0_13, %c0_14] : memref<1x8x1xf32, #tpu.memory_space<vmem>>, vector<1x8x1xf32>
    %16 = vector.shape_cast %15 : vector<1x8x1xf32> to vector<8x1xf32>
    %17 = arith.mulf %6, %6 : vector<8x256xf32>
    %cst_15 = arith.constant dense<0.000000e+00> : vector<8xf32>
    %18 = vector.multi_reduction <add>, %17, %cst_15 [1] : vector<8x256xf32> to vector<8xf32>
    %19 = vector.shape_cast %18 : vector<8xf32> to vector<8x1xf32>
    %20 = arith.addf %16, %19 : vector<8x1xf32>
    %c0_16 = arith.constant 0 : index
    %c0_17 = arith.constant 0 : index
    %c0_18 = arith.constant 0 : index
    %21 = vector.load %arg5[%c0_16, %c0_17, %c0_18] : memref<1x8x1xf32, #tpu.memory_space<vmem>>, vector<1x8x1xf32>
    %22 = vector.shape_cast %21 : vector<1x8x1xf32> to vector<8x1xf32>
    %23 = vector.shape_cast %20 : vector<8x1xf32> to vector<1x8x1xf32>
    tpu.vector_store %arg5[%c0_16, %c0_17, %c0_18], %23 {strides = array<i32>} : memref<1x8x1xf32, #tpu.memory_space<vmem>>, vector<1x8x1xf32>,
    return
  }
  func.func @transform_0(%arg0: i32, %arg1: i32) -> (i32, i32) {
    %c0_i32 = arith.constant 0 : i32
    %c0_i32_0 = arith.constant 0 : i32
    %c0_i32_1 = arith.constant 0 : i32
    return %c0_i32, %c0_i32_0 : i32, i32
  }
  func.func @transform_1(%arg0: i32, %arg1: i32) -> (i32, i32, i32) {
    %c0_i32 = arith.constant 0 : i32
    %c0_i32_0 = arith.constant 0 : i32
    return %arg0, %c0_i32, %arg1 : i32, i32, i32
  }
  func.func @transform_2(%arg0: i32, %arg1: i32) -> (i32, i32, i32) {
    %c0_i32 = arith.constant 0 : i32
    %c0_i32_0 = arith.constant 0 : i32
    %c0_i32_1 = arith.constant 0 : i32
    return %arg0, %c0_i32, %c0_i32_0 : i32, i32, i32
  }
  func.func @transform_3(%arg0: i32, %arg1: i32) -> (i32, i32, i32) {
    %c0_i32 = arith.constant 0 : i32
    %c0_i32_0 = arith.constant 0 : i32
    %c0_i32_1 = arith.constant 0 : i32
    return %arg0, %c0_i32, %c0_i32_0 : i32, i32, i32
  }
}

</mosaic_0001>

<bundles_post_ra>
// kernel: tpu_custom_call.1
= control target key start
LH: loop header
LB: loop body
LE: loop exit
PB: predicated region body
PF: predicated region fallthrough
CT: control target
= control target key end

     0   :  { %9 = vsyncpa [#allocation3], 0  ;;  %s676_s0 = inlined_call_operand.vmem [shape: f32[8,4], index: 0, kind: input, shape index: {}]   ;;  %s677_s1 = inlined_call_operand.hbm [shape: f32[2,4,256], index: 1, kind: input, shape index: {}]   ;;  %s678_s2 = inlined_call_operand.vmem [shape: f32[2,8,1], index: 2, kind: output, shape index: {0}]   ;;  %s679_s3 = inlined_call_operand.vmem [shape: f32[2,8,1], index: 3, kind: output, shape index: {1}]  }
   0x1   :  { %11 = vsyncpa [#allocation3 + $0x1], 0  ;;  %s578_s12 = smov 0   ;;  %s580_s13 = smov 0  }
   0x2   :  { %s582_s14 = smov 0   ;;  %s584_s15 = smov 0  }
   0x3   :  { %s586_s16 = smov 0   ;;  %s588_s17 = smov 0  }
   0x4 LB: > { %s401_s18 = sadd.s32 4294967295, %s555_s17   ;;  %s29_s19 = sadd.s32 1, %s551_s16  ;;  %s555_s17 = sphi %s588_s17, %s17_s17   ;;  %s551_s16 = sphi %s586_s16, %s686_s16   ;;  %s547_s15 = sphi %s584_s15, %s685_s15   ;;  %s543_s14 = sphi %s582_s14, %s684_s14   ;;  %s539_s13 = sphi %s580_s13, %s683_s13   ;;  %s535_s12 = sphi %s578_s12, %s682_s12  }
   0x5   : > { %p31_p0 = scmp.ge.s32.totalorder %s29_s19, 2  ;;  %s59_s20 = sadd.s32 1, %s543_s14 }
   0x6   : > { %p66_p1 = scmp.ne.s32.totalorder %s543_s14, %s539_s13  ;;  %p67_p2 = scmp.eq.s32.totalorder %s555_s17, 0 }
   0x7   : > { %s688_s19 = smov (%p31_p0, %s29_s19), 0  ;;  %p72_p4 = scmp.ne.s32.totalorder %s539_s13, %s535_s12 }
   0x8   : > { %p614_p3 = por %p67_p2, %p66_p1  ;;  %s54_s22 = ssub.s32 %s551_s16, %s688_s19 }
   0x9   : > { %p73_p5 = scmp.eq.s32.totalorder %s401_s18, 0  ;;  %p57_p6 = scmp.eq.s32.totalorder %s54_s22, 0 }
   0xa   : > { %p425_p8 = scmp.lt.s32.totalorder %s555_s17, 2  ;;  %s151_s25 = sand.u32 1, %s543_s14  }
   0xb   : > { %p621_p7 = por %p73_p5, %p72_p4  ;;  %s418_s26 = sshll.u32 %s551_s16, 3 }
   0xc   : > { %s627_s24 = scalar_select %p57_p6, %s543_s14, %s59_s20  }
   0xd   : > { %s405_s27 = sshll.u32 %s151_s25, 3  ;;  %s162_s30 = scalar_lea.hbm %s677_s1, %s418_s26 }
   0xe   : > { %s164_s4 = sshll.u32 %s162_s30, 4  ;;  %s155_s5 = scalar_lea.vmem [#allocation2], %s405_s27  ;;  %s165_s4 = int_to_ptr.hbm [resolvable:$true] %s164_s4 }
   0xf   : > { %s166_s6 = sshll.u32 %s155_s5, 4  ;;  %p422_p9 = pnand %p425_p8, %p614_p3  ;;  %s167_s6 = int_to_ptr.vmem [resolvable:$true] %s166_s6 }
  0x10   : > { %p408_p10 = scmp.ge.s32.totalorder %s555_s17, 1  ;;  %p171_p11 = scmp.lt.s32.totalorder %s555_s17, 3 }
  0x11   : > { %s152_s7 = scalar_lea.sflag [#allocation3], %s151_s25 }
  0x12   : > { %424 = dma.hbm_to_vmem [thread:$0]  (!%p422_p9), %s165_s4, 128, %s167_s6, %s152_s7  }
  0x13   : > { %p172_p12 = pnand %p408_p10, %p171_p11 }
  0x14   : > { %s177_s8 = sand.u32 (!%p172_p12), 1, %s539_s13  }
  0x15   : > { %175 = sbr.rel (%p172_p12) target bundleno = 292 (0x124), region = 28  ;;  %s409_s9 = sshll.u32 (!%p172_p12), %s177_s8, 3 }
  0x16   : > { %s178_s10 = scalar_lea.sflag (!%p172_p12), [#allocation3], %s177_s8  ;;  %s181_s11 = scalar_lea.vmem (!%p172_p12), [#allocation2], %s409_s9 }
  0x1a   : > { %530 = dma.done.wait (%p621_p7), %s178_s10, 128  }
  0x1b   : > { %532 = vsyncadd (%p621_p7), %s178_s10, 4294967168  ;;  %v225_v0 = vld [vmem:[%s181_s11] sm:$0xff]  ;;  %vm234_vm0 = vcmask 1043456   ;;  %v224_v1 = vld [vmem:[%s676_s0] sm:$0xff]  ;;  %vm230_vm1 = vcmask 31744   ;;  %p209_p13 = scmp.lt.s32.totalorder %s547_s15, 1 }
  0x1c   : > { %227 = vst [vmem:[#allocation1] ss:$2 sm:$0xff] %v225_v0  ;;  %vm221_vm2 = vcmask 7168   ;;  %v557_v4 = vmov 0.0  }
  0x1d   : > { %s690_s15 = smov (!%p209_p13, %s547_s15), 1 }
  0x1e   : > { %s410_s20 = sshll.u32 %s690_s15, 3 }
  0x1f   : > { %s212_s23 = scalar_lea.vmem %s678_s2, %s410_s20  ;;  %s216_s27 = scalar_lea.vmem %s679_s3, %s410_s20 }
  0x20   : > { %222 = vst.msk [vmem:[%s212_s23] sm:$0xff] %vm221_vm2, %v557_v4 }
  0x21   : > { %223 = vst.msk [vmem:[%s216_s27] sm:$0xff] %vm221_vm2, %v557_v4 }
  0x23   : > { %v228_v2 = vld.sshfl [vmem:[#allocation1] sm:$0xff pattern:$0x75316420]  ;;  %v229_v3 = vld.sshfl [vmem:[#allocation1 + $0x8] sm:$0xff pattern:$0x75316420] }
  0x24   : > { %412 = vmatpush.msk.msra.mxu0 %vm234_vm0, %v228_v2  ;;  %414 = vmatpush.msk.msra.mxu1 %vm234_vm0, %v229_v3 }
  0x25   : > { %413 = vmatmul.msk.f32.vlgmr.msra.gmra.mxu0 %vm230_vm1, %v224_v1  ;;  %415 = vmatmul.msk.f32.vlgmr.msra.gmra.mxu1 %vm230_vm1, %v224_v1 }
  0x27   : > { %v279_v11 = vld [vmem:[%s212_s23] sm:$0xff] }
  0x28   : > { %v286_v14 = vld [vmem:[%s216_s27] sm:$0xff] }
  0xa2   : > { %v256_v5 = vpop.f32.mrf.mxu0  ;;  %v276_v6 = vpop.f32.mrf.mxu1 }
  0xa3   : > { %v280_v7 = vadd.f32 %v276_v6, %v256_v5  ;;  %v287_v8 = vmul.f32 %v256_v5, %v256_v5  ;;  %v288_v9 = vmul.f32 %v276_v6, %v276_v6 }
  0xa5   : > { %281 = vadd.xlane.f32.xlu0 %v280_v7  ;;  %v289_v10 = vadd.f32 %v288_v9, %v287_v8 }
  0xad   : > { %290 = vadd.xlane.f32.xlu0 %v289_v10 }
 0x118   : > { %v282_v12 = vpop.xlane.xlu0 %281 }
 0x119   : > { %v283_v13 = vadd.f32 %v282_v12, %v279_v11 }
 0x11b   : > { %285 = vst.msk [vmem:[%s212_s23] sm:$0xff] %vm221_vm2, %v283_v13 }
 0x120   : > { %v291_v15 = vpop.xlane.xlu0 %290 }
 0x121   : > { %v292_v16 = vadd.f32 %v291_v15, %v286_v14 }
 0x123   : > { %293 = vst.msk [vmem:[%s216_s27] sm:$0xff] %vm221_vm2, %v292_v16 }
 0x124 PF: > { %s17_s17 = sadd.s32 1, %s555_s17   ;;  %s682_s12 = smov %s539_s13 }
 0x125   : > { %p14_p0 = scmp.ge.s32.totalorder %s17_s17, 4   ;;  %s683_s13 = smov %s543_s14 }
 0x126   : > { %s684_s14 = smov %s627_s24  ;;  %s685_s15 = smov %s551_s16 }
 0x127   : > { %s686_s16 = smov %s688_s19  ;;  %16 = sbr.rel (!%p14_p0) target bundleno = 4 (0x4), region = 84 }
 0x12c   :  { %327 = vsyncpa [#allocation3], 1 }
 0x12d   :  { %329 = vsyncpa [#allocation3 + $0x1], 1 }

</bundles_post_ra>
